<compile_context>
chip_gen: v6e
topology: v6e:2x2x1
jax: 0.10.0
libtpu: 0.0.40
codegen_flags: <defaults>
</compile_context>

<pallas_src>
import jax
import jax.numpy as jnp
from jax.experimental import pallas as pl
from jax.experimental.pallas import tpu as pltpu


def _round_up(a, b):
    return (a + b - 1) // b * b


def _tpu_info():
    """(physical VMEM bytes, TensorCores per chip) with conservative fallbacks."""
    vmem_cap = 128 * 1024 * 1024
    n_tc = 1
    try:
        info = pltpu.get_tpu_info()
        vmem_cap = int(getattr(info, "vmem_capacity_bytes", vmem_cap))
    except Exception:
        pass
    try:
        kind = jax.devices()[0].device_kind.lower()
    except Exception:
        kind = ""
    if "v7" in kind:
        n_tc = 2
        vmem_cap = min(vmem_cap, 64 * 1024 * 1024)
    return vmem_cap, n_tc


def _make_spec(shape, index_map, bufs=None):
    """BlockSpec with an optional pipeline-depth hint; falls back gracefully."""
    if bufs is not None:
        try:
            return pl.BlockSpec(shape, index_map, pipeline_mode=pl.Buffered(bufs))
        except Exception:
            pass
    return pl.BlockSpec(shape, index_map)


def _ln_epilogue(h2_f32, x, g_ref, beta_ref, o_ref):
    """ReLU + residual + LayerNorm (two-pass variance), all in f32."""
    y = jnp.maximum(h2_f32, 0.0) + x.astype(jnp.float32)
    mean = jnp.mean(y, axis=-1, keepdims=True)
    yc = y - mean
    var = jnp.mean(yc * yc, axis=-1, keepdims=True)
    y_norm = yc * jax.lax.rsqrt(var + 1e-5)
    o_ref[...] = (y_norm * g_ref[...].astype(jnp.float32)
                  + beta_ref[...].astype(jnp.float32)).astype(o_ref.dtype)


def ffn_kernel(x_ref, w1_ref, b1_ref, w2_ref, b2_ref, g_ref, beta_ref, o_ref):
    """Single-pass kernel: full d_ff resident in VMEM."""
    x = x_ref[...]
    xb = x.astype(jnp.bfloat16)                                   # MXU in bf16
    h1 = jnp.dot(xb, w1_ref[...], preferred_element_type=jnp.float32)
    h1 = h1 + b1_ref[...].astype(jnp.float32)
    h2 = jnp.dot(h1.astype(jnp.bfloat16), w2_ref[...],
                 preferred_element_type=jnp.float32)
    h2 = h2 + b2_ref[...].astype(jnp.float32)
    _ln_epilogue(h2, x, g_ref, beta_ref, o_ref)


def ffn_kernel_ksplit(x_ref, w1_ref, b1_ref, w2_ref, b2_ref, g_ref, beta_ref,
                      o_ref, acc_ref):
    """d_ff split across grid axis 1 ("arbitrary") with f32 VMEM accumulator."""
    k = pl.program_id(1)

    @pl.when(k == 0)
    def _():
        acc_ref[...] = jnp.zeros_like(acc_ref)

    x = x_ref[...]
    xb = x.astype(jnp.bfloat16)
    h1 = jnp.dot(xb, w1_ref[...], preferred_element_type=jnp.float32)
    h1 = h1 + b1_ref[...].astype(jnp.float32)
    acc_ref[...] += jnp.dot(h1.astype(jnp.bfloat16), w2_ref[...],
                            preferred_element_type=jnp.float32)

    @pl.when(k == pl.num_programs(1) - 1)
    def _():
        h2 = acc_ref[...] + b2_ref[...].astype(jnp.float32)
        _ln_epilogue(h2, x, g_ref, beta_ref, o_ref)


def feed_forward(x, w1, b1, w2, b2, gamma, beta, *,
                 tm=512, tk=None, force_ksplit=False):
    """x: (B, L, d_model). w1: (d_model, d_ff), w2: (d_ff, d_model)."""
    B, L, d_model = x.shape
    d_ff = w1.shape[1]
    N = B * L

    vmem_cap, n_tc = _tpu_info()
    vmem_budget = int(vmem_cap * 0.8)          # leave compiler-scratch headroom
    x_itemsize = jnp.dtype(x.dtype).itemsize
    w_bytes_bf16 = 2 * 2 * d_model * d_ff      # both weights stored as bf16

    # --- row tiling -----------------------------------------------------------
    N_r8 = _round_up(N, 8)
    if N_r8 <= tm:
        tm_eff = N_r8                          # tiny N: one grid step, no padding
        if n_tc >= 2 and N_r8 >= 256:          # v7x only: keep both TCs busy
            tm_eff = _round_up(pl.cdiv(N, 2), 128)
    else:
        tm_eff = tm
        # allow a 1024-row tile when rows and VMEM permit (amortizes step cost)
        if tm_eff < 1024 and N_r8 >= 1024 * n_tc:
            big = (w_bytes_bf16 + 4 * 1024 * d_model * x_itemsize
                   + 4 * 1024 * (d_ff + 4 * d_model))
            if big <= vmem_budget // 2:
                tm_eff = 1024
    N_pad = _round_up(N, tm_eff)

    # --- d_ff split decision --------------------------------------------------
    h1_bytes = 4 * tm_eff * d_ff               # (tm, d_ff) f32 intermediate
    use_ksplit = force_ksplit or (w_bytes_bf16 + h1_bytes > vmem_budget // 2)
    if use_ksplit:
        tk_eff = tk if tk is not None else 512     # multiple of 512: wide MXU K
        tk_eff = min(tk_eff, _round_up(d_ff, 128))
        d_ff_pad = _round_up(d_ff, tk_eff)
    else:
        tk_eff = d_ff
        d_ff_pad = d_ff

    # --- operand prep (weights in bf16 halves DMA + VMEM footprint) ----------
    x2d = x.reshape(N, d_model)
    if N_pad != N:
        x2d = jnp.pad(x2d, ((0, N_pad - N), (0, 0)))
    w1b = w1.astype(jnp.bfloat16)
    w2b = w2.astype(jnp.bfloat16)
    b1_2d = b1.reshape(1, d_ff).astype(jnp.float32)
    if d_ff_pad != d_ff:                       # zero padding contributes nothing
        w1b = jnp.pad(w1b, ((0, 0), (0, d_ff_pad - d_ff)))
        w2b = jnp.pad(w2b, ((0, d_ff_pad - d_ff), (0, 0)))
        b1_2d = jnp.pad(b1_2d, ((0, 0), (0, d_ff_pad - d_ff)))
    b2_2d = b2.reshape(1, d_model).astype(jnp.float32)
    g_2d = gamma.reshape(1, d_model).astype(jnp.float32)
    be_2d = beta.reshape(1, d_model).astype(jnp.float32)

    # --- VMEM limit & cost ----------------------------------------------------
    if use_ksplit:
        res_w = 2 * 2 * (d_model * tk_eff + tk_eff * d_model)  # 2-buf bf16 k-tiles
    else:
        res_w = 2 * (d_model * d_ff_pad + d_ff_pad * d_model)  # resident bf16
    vmem_est = (res_w
                + 4 * tm_eff * d_model * x_itemsize            # x + out tiles, 2-buf
                + 4 * tm_eff * (tk_eff + 5 * d_model)           # f32 intermediates
                + (1 << 20))
    vmem_limit = int(min(max(vmem_est, 32 * 1024 * 1024), vmem_budget))

    param_bytes = (int(w1b.size) * 2 + int(w2b.size) * 2
                   + 4 * (int(b1_2d.size) + int(b2_2d.size)
                          + int(g_2d.size) + int(be_2d.size)))
    cost = pl.CostEstimate(
        flops=4 * N_pad * d_model * d_ff_pad,
        transcendentals=N_pad,
        bytes_accessed=2 * N_pad * d_model * x_itemsize + param_bytes,
    )

    def _call(use_hints):
        wbuf = 1 if use_hints else None                      # invariant operands
        deep = 3 if (use_hints and n_tc >= 2 and not use_ksplit
                     and d_ff_pad <= 2048) else None         # v7x, HBM-bound case
        if use_ksplit:
            grid = (N_pad // tm_eff, d_ff_pad // tk_eff)
            in_specs = [
                pl.BlockSpec((tm_eff, d_model), lambda i, k: (i, 0)),     # x rows
                pl.BlockSpec((d_model, tk_eff), lambda i, k: (0, k)),     # W1 k-tile
                pl.BlockSpec((1, tk_eff), lambda i, k: (0, k)),           # b1 k-tile
                pl.BlockSpec((tk_eff, d_model), lambda i, k: (k, 0)),     # W2 k-tile
                _make_spec((1, d_model), lambda i, k: (0, 0), wbuf),      # b2
                _make_spec((1, d_model), lambda i, k: (0, 0), wbuf),      # gamma
                _make_spec((1, d_model), lambda i, k: (0, 0), wbuf),      # beta
            ]
            out_spec = pl.BlockSpec((tm_eff, d_model), lambda i, k: (i, 0))
            scratch = [pltpu.VMEM((tm_eff, d_model), jnp.float32)]
            sem = ("parallel", "arbitrary")
            kern = ffn_kernel_ksplit
        else:
            grid = (N_pad // tm_eff,)
            in_specs = [
                _make_spec((tm_eff, d_model), lambda i: (i, 0), deep),    # x rows
                _make_spec((d_model, d_ff_pad), lambda i: (0, 0), wbuf),  # W1
                _make_spec((1, d_ff_pad), lambda i: (0, 0), wbuf),        # b1
                _make_spec((d_ff_pad, d_model), lambda i: (0, 0), wbuf),  # W2
                _make_spec((1, d_model), lambda i: (0, 0), wbuf),         # b2
                _make_spec((1, d_model), lambda i: (0, 0), wbuf),         # gamma
                _make_spec((1, d_model), lambda i: (0, 0), wbuf),         # beta
            ]
            out_spec = _make_spec((tm_eff, d_model), lambda i: (i, 0), deep)
            scratch = []
            sem = ("parallel",)
            kern = ffn_kernel

        return pl.pallas_call(
            kern,
            out_shape=jax.ShapeDtypeStruct((N_pad, d_model), x.dtype),
            grid_spec=pltpu.PrefetchScalarGridSpec(
                num_scalar_prefetch=0, grid=grid,
                in_specs=in_specs, out_specs=out_spec,
                scratch_shapes=scratch),
            compiler_params=pltpu.CompilerParams(
                dimension_semantics=sem, vmem_limit_bytes=vmem_limit),
            cost_estimate=cost,
        )(x2d, w1b, b1_2d, w2b, b2_2d, g_2d, be_2d)

    try:
        out2d = _call(True)
    except Exception:
        out2d = _call(False)      # retry without pipeline_mode hints

    return out2d[:N].reshape(B, L, d_model)


if __name__ == "__main__":
    # d_model=128 keeps the output lane-dense (full 128-lane stores);
    # kernel_size=1 is required for the residual add in the PyTorch forward.
    B, L, d_model, d_ff = 2, 16, 128, 256

    key = jax.random.PRNGKey(0)
    kx, kw1, kb1, kw2, kb2 = jax.random.split(key, 5)

    x = jax.random.normal(kx, (B, L, d_model), dtype=jnp.float32)
    # Conv1d weights in PyTorch are (out, in, 1); the (in, out) linear
    # equivalents are stored directly (W1 = conv1.weight[:, :, 0].T).
    w1 = jax.random.normal(kw1, (d_model, d_ff), dtype=jnp.float32) * 0.1
    b1 = jax.random.normal(kb1, (d_ff,), dtype=jnp.float32) * 0.1
    w2 = jax.random.normal(kw2, (d_ff, d_model), dtype=jnp.float32) * 0.1
    b2 = jax.random.normal(kb2, (d_model,), dtype=jnp.float32) * 0.1
    gamma = jnp.ones((d_model,), dtype=jnp.float32)     # LayerNorm weight
    beta = jnp.zeros((d_model,), dtype=jnp.float32)     # LayerNorm bias

    def reference(mm_dtype):
        h = jnp.einsum("bld,df->blf", x.astype(mm_dtype), w1.astype(mm_dtype),
                       preferred_element_type=jnp.float32) + b1
        h = jnp.einsum("blf,fd->bld", h.astype(mm_dtype), w2.astype(mm_dtype),
                       preferred_element_type=jnp.float32) + b2
        y = jnp.maximum(h, 0.0) + x
        mu = y.mean(-1, keepdims=True)
        var = ((y - mu) ** 2).mean(-1, keepdims=True)
        return (y - mu) * jax.lax.rsqrt(var + 1e-5) * gamma + beta

    out = feed_forward(x, w1, b1, w2, b2, gamma, beta)
    jax.block_until_ready(out)
    assert out.shape == (B, L, d_model)

    ref_bf16 = reference(jnp.bfloat16)   # matches kernel MXU numerics
    ref_f32 = reference(jnp.float32)     # exact module semantics
    err_bf16 = float(jnp.max(jnp.abs(out - ref_bf16)))
    err_f32 = float(jnp.max(jnp.abs(out - ref_f32)))
    assert jnp.allclose(out, ref_bf16, atol=5e-3, rtol=5e-3), err_bf16
    assert jnp.allclose(out, ref_f32, atol=1.5e-1, rtol=0.0), err_f32

    # Exercise the d_ff K-split path (auto-selected at production d_ff on v7x).
    out_ks = feed_forward(x, w1, b1, w2, b2, gamma, beta,
                          force_ksplit=True, tk=128)
    jax.block_until_ready(out_ks)
    assert jnp.allclose(out_ks, ref_bf16, atol=5e-3, rtol=5e-3), \
        float(jnp.max(jnp.abs(out_ks - ref_bf16)))

    print("KERNEL_OK")
</pallas_src>

<mosaic_0001>
module attributes {stable_mosaic.version = 11 : i64} {
  func.func @ffn_kernel(%arg0: i32, %arg1: memref<32x128xf32, #tpu.memory_space<vmem>>, %arg2: memref<128x256xbf16, #tpu.memory_space<vmem>>, %arg3: memref<1x256xf32, #tpu.memory_space<vmem>>, %arg4: memref<256x128xbf16, #tpu.memory_space<vmem>>, %arg5: memref<1x128xf32, #tpu.memory_space<vmem>>, %arg6: memref<1x128xf32, #tpu.memory_space<vmem>>, %arg7: memref<1x128xf32, #tpu.memory_space<vmem>>, %arg8: memref<32x128xf32, #tpu.memory_space<vmem>>) attributes {dimension_semantics = [#tpu.dimension_semantics<parallel>], iteration_bounds = array<i64: 1>, scalar_prefetch = 0 : i64, scratch_operands = 0 : i64, tpu.core_type = #tpu.core_type<tc>, window_params = [{transform_indices = @transform_0, window_bounds = array<i64: 32, 128>}, {pipeline_mode = #tpu.pipeline_mode<synchronous>, transform_indices = @transform_1, window_bounds = array<i64: 128, 256>}, {pipeline_mode = #tpu.pipeline_mode<synchronous>, transform_indices = @transform_2, window_bounds = array<i64: 1, 256>}, {pipeline_mode = #tpu.pipeline_mode<synchronous>, transform_indices = @transform_3, window_bounds = array<i64: 256, 128>}, {pipeline_mode = #tpu.pipeline_mode<synchronous>, transform_indices = @transform_4, window_bounds = array<i64: 1, 128>}, {pipeline_mode = #tpu.pipeline_mode<synchronous>, transform_indices = @transform_5, window_bounds = array<i64: 1, 128>}, {pipeline_mode = #tpu.pipeline_mode<synchronous>, transform_indices = @transform_6, window_bounds = array<i64: 1, 128>}, {transform_indices = @transform_7, window_bounds = array<i64: 32, 128>}]} {
    %c0 = arith.constant 0 : index
    %c0_0 = arith.constant 0 : index
    %0 = vector.load %arg1[%c0, %c0_0] : memref<32x128xf32, #tpu.memory_space<vmem>>, vector<32x128xf32>
    %1 = arith.truncf %0 : vector<32x128xf32> to vector<32x128xbf16>
    %c0_1 = arith.constant 0 : index
    %c0_2 = arith.constant 0 : index
    %2 = vector.load %arg2[%c0_1, %c0_2] : memref<128x256xbf16, #tpu.memory_space<vmem>>, vector<128x256xbf16>
    %cst = arith.constant dense<0.000000e+00> : vector<32x256xf32>
    %3 = tpu.matmul %1, %2, %cst {dimension_numbers = #tpu.dot_dimension_numbers<[1], [0], [0], [1], [0, 0, 1, 1], [], []>} : vector<32x128xbf16>, vector<128x256xbf16>, vector<32x256xf32> -> vector<32x256xf32>
    %c0_3 = arith.constant 0 : index
    %c0_4 = arith.constant 0 : index
    %4 = vector.load %arg3[%c0_3, %c0_4] : memref<1x256xf32, #tpu.memory_space<vmem>>, vector<1x256xf32>
    %5 = vector.broadcast %4 : vector<1x256xf32> to vector<32x256xf32>
    %6 = arith.addf %3, %5 : vector<32x256xf32>
    %7 = arith.truncf %6 : vector<32x256xf32> to vector<32x256xbf16>
    %c0_5 = arith.constant 0 : index
    %c0_6 = arith.constant 0 : index
    %8 = vector.load %arg4[%c0_5, %c0_6] : memref<256x128xbf16, #tpu.memory_space<vmem>>, vector<256x128xbf16>
    %cst_7 = arith.constant dense<0.000000e+00> : vector<32x128xf32>
    %9 = tpu.matmul %7, %8, %cst_7 {dimension_numbers = #tpu.dot_dimension_numbers<[1], [0], [0], [1], [0, 0, 1, 1], [], []>} : vector<32x256xbf16>, vector<256x128xbf16>, vector<32x128xf32> -> vector<32x128xf32>
    %c0_8 = arith.constant 0 : index
    %c0_9 = arith.constant 0 : index
    %10 = vector.load %arg5[%c0_8, %c0_9] : memref<1x128xf32, #tpu.memory_space<vmem>>, vector<1x128xf32>
    %11 = vector.broadcast %10 : vector<1x128xf32> to vector<32x128xf32>
    %12 = arith.addf %9, %11 : vector<32x128xf32>
    %cst_10 = arith.constant 0.000000e+00 : f32
    %13 = vector.broadcast %cst_10 : f32 to vector<32x128xf32>
    %14 = arith.maximumf %12, %13 : vector<32x128xf32>
    %15 = arith.addf %14, %0 : vector<32x128xf32>
    %cst_11 = arith.constant dense<0.000000e+00> : vector<32xf32>
    %16 = vector.multi_reduction <add>, %15, %cst_11 [1] : vector<32x128xf32> to vector<32xf32>
    %17 = vector.shape_cast %16 : vector<32xf32> to vector<32x1xf32>
    %cst_12 = arith.constant 1.280000e+02 : f32
    %18 = vector.broadcast %cst_12 : f32 to vector<32x1xf32>
    %19 = arith.divf %17, %18 : vector<32x1xf32>
    %20 = vector.broadcast %19 : vector<32x1xf32> to vector<32x128xf32>
    %21 = arith.subf %15, %20 : vector<32x128xf32>
    %22 = arith.mulf %21, %21 : vector<32x128xf32>
    %cst_13 = arith.constant dense<0.000000e+00> : vector<32xf32>
    %23 = vector.multi_reduction <add>, %22, %cst_13 [1] : vector<32x128xf32> to vector<32xf32>
    %24 = vector.shape_cast %23 : vector<32xf32> to vector<32x1xf32>
    %cst_14 = arith.constant 1.280000e+02 : f32
    %25 = vector.broadcast %cst_14 : f32 to vector<32x1xf32>
    %26 = arith.divf %24, %25 : vector<32x1xf32>
    %cst_15 = arith.constant 9.99999974E-6 : f32
    %27 = vector.broadcast %cst_15 : f32 to vector<32x1xf32>
    %28 = arith.addf %26, %27 : vector<32x1xf32>
    %29 = math.rsqrt %28 : vector<32x1xf32>
    %30 = vector.broadcast %29 : vector<32x1xf32> to vector<32x128xf32>
    %31 = arith.mulf %21, %30 : vector<32x128xf32>
    %c0_16 = arith.constant 0 : index
    %c0_17 = arith.constant 0 : index
    %32 = vector.load %arg6[%c0_16, %c0_17] : memref<1x128xf32, #tpu.memory_space<vmem>>, vector<1x128xf32>
    %33 = vector.broadcast %32 : vector<1x128xf32> to vector<32x128xf32>
    %34 = arith.mulf %31, %33 : vector<32x128xf32>
    %c0_18 = arith.constant 0 : index
    %c0_19 = arith.constant 0 : index
    %35 = vector.load %arg7[%c0_18, %c0_19] : memref<1x128xf32, #tpu.memory_space<vmem>>, vector<1x128xf32>
    %36 = vector.broadcast %35 : vector<1x128xf32> to vector<32x128xf32>
    %37 = arith.addf %34, %36 : vector<32x128xf32>
    %c0_20 = arith.constant 0 : index
    %c0_21 = arith.constant 0 : index
    %38 = vector.load %arg8[%c0_20, %c0_21] : memref<32x128xf32, #tpu.memory_space<vmem>>, vector<32x128xf32>
    tpu.vector_store %arg8[%c0_20, %c0_21], %37 {strides = array<i32>} : memref<32x128xf32, #tpu.memory_space<vmem>>, vector<32x128xf32>,
    return
  }
  func.func @transform_0(%arg0: i32) -> (i32, i32) {
    %c0_i32 = arith.constant 0 : i32
    %c0_i32_0 = arith.constant 0 : i32
    return %arg0, %c0_i32 : i32, i32
  }
  func.func @transform_1(%arg0: i32) -> (i32, i32) {
    %c0_i32 = arith.constant 0 : i32
    %c0_i32_0 = arith.constant 0 : i32
    %c0_i32_1 = arith.constant 0 : i32
    return %c0_i32, %c0_i32_0 : i32, i32
  }
  func.func @transform_2(%arg0: i32) -> (i32, i32) {
    %c0_i32 = arith.constant 0 : i32
    %c0_i32_0 = arith.constant 0 : i32
    %c0_i32_1 = arith.constant 0 : i32
    return %c0_i32, %c0_i32_0 : i32, i32
  }
  func.func @transform_3(%arg0: i32) -> (i32, i32) {
    %c0_i32 = arith.constant 0 : i32
    %c0_i32_0 = arith.constant 0 : i32
    %c0_i32_1 = arith.constant 0 : i32
    return %c0_i32, %c0_i32_0 : i32, i32
  }
  func.func @transform_4(%arg0: i32) -> (i32, i32) {
    %c0_i32 = arith.constant 0 : i32
    %c0_i32_0 = arith.constant 0 : i32
    %c0_i32_1 = arith.constant 0 : i32
    return %c0_i32, %c0_i32_0 : i32, i32
  }
  func.func @transform_5(%arg0: i32) -> (i32, i32) {
    %c0_i32 = arith.constant 0 : i32
    %c0_i32_0 = arith.constant 0 : i32
    %c0_i32_1 = arith.constant 0 : i32
    return %c0_i32, %c0_i32_0 : i32, i32
  }
  func.func @transform_6(%arg0: i32) -> (i32, i32) {
    %c0_i32 = arith.constant 0 : i32
    %c0_i32_0 = arith.constant 0 : i32
    %c0_i32_1 = arith.constant 0 : i32
    return %c0_i32, %c0_i32_0 : i32, i32
  }
  func.func @transform_7(%arg0: i32) -> (i32, i32) {
    %c0_i32 = arith.constant 0 : i32
    %c0_i32_0 = arith.constant 0 : i32
    return %arg0, %c0_i32 : i32, i32
  }
}

module attributes {stable_mosaic.version = 11 : i64} {
  func.func @ffn_kernel(%arg0: i32, %arg1: memref<32x128xf32, #tpu.memory_space<vmem>>, %arg2: memref<128x256xbf16, #tpu.memory_space<vmem>>, %arg3: memref<1x256xf32, #tpu.memory_space<vmem>>, %arg4: memref<256x128xbf16, #tpu.memory_space<vmem>>, %arg5: memref<1x128xf32, #tpu.memory_space<vmem>>, %arg6: memref<1x128xf32, #tpu.memory_space<vmem>>, %arg7: memref<1x128xf32, #tpu.memory_space<vmem>>, %arg8: memref<32x128xf32, #tpu.memory_space<vmem>>) attributes {dimension_semantics = [#tpu.dimension_semantics<parallel>], iteration_bounds = array<i64: 1>, scalar_prefetch = 0 : i64, scratch_operands = 0 : i64, tpu.core_type = #tpu.core_type<tc>, window_params = [{transform_indices = @transform_0, window_bounds = array<i64: 32, 128>}, {pipeline_mode = #tpu.pipeline_mode<synchronous>, transform_indices = @transform_1, window_bounds = array<i64: 128, 256>}, {pipeline_mode = #tpu.pipeline_mode<synchronous>, transform_indices = @transform_2, window_bounds = array<i64: 1, 256>}, {pipeline_mode = #tpu.pipeline_mode<synchronous>, transform_indices = @transform_3, window_bounds = array<i64: 256, 128>}, {pipeline_mode = #tpu.pipeline_mode<synchronous>, transform_indices = @transform_4, window_bounds = array<i64: 1, 128>}, {pipeline_mode = #tpu.pipeline_mode<synchronous>, transform_indices = @transform_5, window_bounds = array<i64: 1, 128>}, {pipeline_mode = #tpu.pipeline_mode<synchronous>, transform_indices = @transform_6, window_bounds = array<i64: 1, 128>}, {transform_indices = @transform_7, window_bounds = array<i64: 32, 128>}]} {
    %c0 = arith.constant 0 : index
    %c0_0 = arith.constant 0 : index
    %0 = vector.load %arg1[%c0, %c0_0] : memref<32x128xf32, #tpu.memory_space<vmem>>, vector<32x128xf32>
    %1 = arith.truncf %0 : vector<32x128xf32> to vector<32x128xbf16>
    %c0_1 = arith.constant 0 : index
    %c0_2 = arith.constant 0 : index
    %2 = vector.load %arg2[%c0_1, %c0_2] : memref<128x256xbf16, #tpu.memory_space<vmem>>, vector<128x256xbf16>
    %cst = arith.constant dense<0.000000e+00> : vector<32x256xf32>
    %3 = tpu.matmul %1, %2, %cst {dimension_numbers = #tpu.dot_dimension_numbers<[1], [0], [0], [1], [0, 0, 1, 1], [], []>} : vector<32x128xbf16>, vector<128x256xbf16>, vector<32x256xf32> -> vector<32x256xf32>
    %c0_3 = arith.constant 0 : index
    %c0_4 = arith.constant 0 : index
    %4 = vector.load %arg3[%c0_3, %c0_4] : memref<1x256xf32, #tpu.memory_space<vmem>>, vector<1x256xf32>
    %5 = vector.broadcast %4 : vector<1x256xf32> to vector<32x256xf32>
    %6 = arith.addf %3, %5 : vector<32x256xf32>
    %7 = arith.truncf %6 : vector<32x256xf32> to vector<32x256xbf16>
    %c0_5 = arith.constant 0 : index
    %c0_6 = arith.constant 0 : index
    %8 = vector.load %arg4[%c0_5, %c0_6] : memref<256x128xbf16, #tpu.memory_space<vmem>>, vector<256x128xbf16>
    %cst_7 = arith.constant dense<0.000000e+00> : vector<32x128xf32>
    %9 = tpu.matmul %7, %8, %cst_7 {dimension_numbers = #tpu.dot_dimension_numbers<[1], [0], [0], [1], [0, 0, 1, 1], [], []>} : vector<32x256xbf16>, vector<256x128xbf16>, vector<32x128xf32> -> vector<32x128xf32>
    %c0_8 = arith.constant 0 : index
    %c0_9 = arith.constant 0 : index
    %10 = vector.load %arg5[%c0_8, %c0_9] : memref<1x128xf32, #tpu.memory_space<vmem>>, vector<1x128xf32>
    %11 = vector.broadcast %10 : vector<1x128xf32> to vector<32x128xf32>
    %12 = arith.addf %9, %11 : vector<32x128xf32>
    %cst_10 = arith.constant 0.000000e+00 : f32
    %13 = vector.broadcast %cst_10 : f32 to vector<32x128xf32>
    %14 = arith.maximumf %12, %13 : vector<32x128xf32>
    %15 = arith.addf %14, %0 : vector<32x128xf32>
    %cst_11 = arith.constant dense<0.000000e+00> : vector<32xf32>
    %16 = vector.multi_reduction <add>, %15, %cst_11 [1] : vector<32x128xf32> to vector<32xf32>
    %17 = vector.shape_cast %16 : vector<32xf32> to vector<32x1xf32>
    %cst_12 = arith.constant 1.280000e+02 : f32
    %18 = vector.broadcast %cst_12 : f32 to vector<32x1xf32>
    %19 = arith.divf %17, %18 : vector<32x1xf32>
    %20 = vector.broadcast %19 : vector<32x1xf32> to vector<32x128xf32>
    %21 = arith.subf %15, %20 : vector<32x128xf32>
    %22 = arith.mulf %21, %21 : vector<32x128xf32>
    %cst_13 = arith.constant dense<0.000000e+00> : vector<32xf32>
    %23 = vector.multi_reduction <add>, %22, %cst_13 [1] : vector<32x128xf32> to vector<32xf32>
    %24 = vector.shape_cast %23 : vector<32xf32> to vector<32x1xf32>
    %cst_14 = arith.constant 1.280000e+02 : f32
    %25 = vector.broadcast %cst_14 : f32 to vector<32x1xf32>
    %26 = arith.divf %24, %25 : vector<32x1xf32>
    %cst_15 = arith.constant 9.99999974E-6 : f32
    %27 = vector.broadcast %cst_15 : f32 to vector<32x1xf32>
    %28 = arith.addf %26, %27 : vector<32x1xf32>
    %29 = math.rsqrt %28 : vector<32x1xf32>
    %30 = vector.broadcast %29 : vector<32x1xf32> to vector<32x128xf32>
    %31 = arith.mulf %21, %30 : vector<32x128xf32>
    %c0_16 = arith.constant 0 : index
    %c0_17 = arith.constant 0 : index
    %32 = vector.load %arg6[%c0_16, %c0_17] : memref<1x128xf32, #tpu.memory_space<vmem>>, vector<1x128xf32>
    %33 = vector.broadcast %32 : vector<1x128xf32> to vector<32x128xf32>
    %34 = arith.mulf %31, %33 : vector<32x128xf32>
    %c0_18 = arith.constant 0 : index
    %c0_19 = arith.constant 0 : index
    %35 = vector.load %arg7[%c0_18, %c0_19] : memref<1x128xf32, #tpu.memory_space<vmem>>, vector<1x128xf32>
    %36 = vector.broadcast %35 : vector<1x128xf32> to vector<32x128xf32>
    %37 = arith.addf %34, %36 : vector<32x128xf32>
    %c0_20 = arith.constant 0 : index
    %c0_21 = arith.constant 0 : index
    %38 = vector.load %arg8[%c0_20, %c0_21] : memref<32x128xf32, #tpu.memory_space<vmem>>, vector<32x128xf32>
    tpu.vector_store %arg8[%c0_20, %c0_21], %37 {strides = array<i32>} : memref<32x128xf32, #tpu.memory_space<vmem>>, vector<32x128xf32>,
    return
  }
  func.func @transform_0(%arg0: i32) -> (i32, i32) {
    %c0_i32 = arith.constant 0 : i32
    %c0_i32_0 = arith.constant 0 : i32
    return %arg0, %c0_i32 : i32, i32
  }
  func.func @transform_1(%arg0: i32) -> (i32, i32) {
    %c0_i32 = arith.constant 0 : i32
    %c0_i32_0 = arith.constant 0 : i32
    %c0_i32_1 = arith.constant 0 : i32
    return %c0_i32, %c0_i32_0 : i32, i32
  }
  func.func @transform_2(%arg0: i32) -> (i32, i32) {
    %c0_i32 = arith.constant 0 : i32
    %c0_i32_0 = arith.constant 0 : i32
    %c0_i32_1 = arith.constant 0 : i32
    return %c0_i32, %c0_i32_0 : i32, i32
  }
  func.func @transform_3(%arg0: i32) -> (i32, i32) {
    %c0_i32 = arith.constant 0 : i32
    %c0_i32_0 = arith.constant 0 : i32
    %c0_i32_1 = arith.constant 0 : i32
    return %c0_i32, %c0_i32_0 : i32, i32
  }
  func.func @transform_4(%arg0: i32) -> (i32, i32) {
    %c0_i32 = arith.constant 0 : i32
    %c0_i32_0 = arith.constant 0 : i32
    %c0_i32_1 = arith.constant 0 : i32
    return %c0_i32, %c0_i32_0 : i32, i32
  }
  func.func @transform_5(%arg0: i32) -> (i32, i32) {
    %c0_i32 = arith.constant 0 : i32
    %c0_i32_0 = arith.constant 0 : i32
    %c0_i32_1 = arith.constant 0 : i32
    return %c0_i32, %c0_i32_0 : i32, i32
  }
  func.func @transform_6(%arg0: i32) -> (i32, i32) {
    %c0_i32 = arith.constant 0 : i32
    %c0_i32_0 = arith.constant 0 : i32
    %c0_i32_1 = arith.constant 0 : i32
    return %c0_i32, %c0_i32_0 : i32, i32
  }
  func.func @transform_7(%arg0: i32) -> (i32, i32) {
    %c0_i32 = arith.constant 0 : i32
    %c0_i32_0 = arith.constant 0 : i32
    return %arg0, %c0_i32 : i32, i32
  }
}

</mosaic_0001>

<bundles_post_ra>
// kernel: tpu_custom_call.1
= control target key start
LH: loop header
LB: loop body
LE: loop exit
PB: predicated region body
PF: predicated region fallthrough
CT: control target
= control target key end

     0   :  { %12 = vsyncpa [#allocation3], 0  ;;  %s825_s0 = inlined_call_operand.hbm [shape: f32[32,128], index: 0, kind: input, shape index: {}]   ;;  %s826_s1 = inlined_call_operand.hbm [shape: bf16[128,256], index: 1, kind: input, shape index: {}]   ;;  %s827_s2 = inlined_call_operand.vmem [shape: f32[1,256], index: 2, kind: input, shape index: {}]   ;;  %s828_s3 = inlined_call_operand.hbm [shape: bf16[256,128], index: 3, kind: input, shape index: {}]   ;;  %s829_s4 = inlined_call_operand.vmem [shape: f32[1,128], index: 4, kind: input, shape index: {}]   ;;  %s830_s5 = inlined_call_operand.vmem [shape: f32[1,128], index: 5, kind: input, shape index: {}]   ;;  %s831_s6 = inlined_call_operand.vmem [shape: f32[1,128], index: 6, kind: input, shape index: {}]   ;;  %s832_s7 = inlined_call_operand.hbm [shape: f32[32,128], index: 7, kind: output, shape index: {}]  }
   0x1   :  { %13 = vsyncpa [#allocation6], 0 }
   0x2   :  { %14 = vsyncpa [#allocation4], 0  ;;  %s727_s24 = smov [#allocation5]   ;;  %s728_s26 = smov [#allocation2]  }
   0x3   :  { %s32_s25 = sshll.u32 %s727_s24, 4  ;;  %s20_s27 = sshll.u32 %s728_s26, 4  ;;  %s33_s25 = int_to_ptr.vmem [resolvable:$true] %s32_s25  ;;  %s21_s27 = int_to_ptr.vmem [resolvable:$true] %s20_s27 }
   0x4   :  { %s649_s28 = scalar_lea.vmem %s33_s25, 2048  ;;  %p654_p1 = scmp.lt.s32.totalorder %s33_s25, %s33_s25 }
   0x5   :  { %p650_p0 = scmp.ne.s32.totalorder %s33_s25, %s649_s28  ;;  %p655_p2 = scmp.lt.s32.totalorder %s649_s28, %s649_s28 }
   0x7   :  { %p656_p3 = por %p655_p2, %p654_p1 }
   0x9   :  { %p657_p4 = pnand %p656_p3, %p650_p0 }
   0xb   :  { %660 = shalt.err (!%p657_p4)
}
   0xc   :  { %s729_s29 = smov 128   ;;  %s730_s30 = smov 8  }
   0xd   :  { %38 = dma.hbm_to_vmem [thread:$0]  %s826_s1, 2048, %s33_s25, [#allocation6], %s729_s29, %s729_s29, %s730_s30  }
   0xe   :  { %s669_s10 = scalar_lea.vmem %s21_s27, 512  ;;  %p674_p6 = scmp.lt.s32.totalorder %s21_s27, %s21_s27 }
   0xf   :  { %p670_p5 = scmp.ne.s32.totalorder %s21_s27, %s669_s10  ;;  %p675_p7 = scmp.lt.s32.totalorder %s669_s10, %s669_s10 }
  0x11   :  { %p676_p8 = por %p675_p7, %p674_p6 }
  0x13   :  { %p677_p9 = pnand %p676_p8, %p670_p5 }
  0x15   :  { %680 = shalt.err (!%p677_p9)
}
  0x16   :  { %26 = dma.hbm_to_vmem [thread:$0]  %s825_s0, 512, %s21_s27, [#allocation3], %s729_s29, %s729_s29, %s730_s30  }
  0x17   :  { %s731_s13 = smov [#allocation7]  }
  0x18   :  { %s46_s14 = sshll.u32 %s731_s13, 4  ;;  %s47_s14 = int_to_ptr.vmem [resolvable:$true] %s46_s14 }
  0x19   :  { %s689_s15 = scalar_lea.vmem %s47_s14, 2048  ;;  %p694_p11 = scmp.lt.s32.totalorder %s47_s14, %s47_s14 }
  0x1a   :  { %p690_p10 = scmp.ne.s32.totalorder %s47_s14, %s689_s15  ;;  %p695_p12 = scmp.lt.s32.totalorder %s689_s15, %s689_s15 }
  0x1c   :  { %p696_p13 = por %p695_p12, %p694_p11 }
  0x1e   :  { %p697_p0 = pnand %p696_p13, %p690_p10 }
  0x20   :  { %700 = shalt.err (!%p697_p0)
}
  0x21   :  { %s732_s1 = smov 64   ;;  %s733_s16 = smov 4  }
  0x22   :  { %52 = dma.hbm_to_vmem [thread:$0]  %s828_s3, 2048, %s47_s14, [#allocation6], %s732_s1, %s732_s1, %s733_s16  }
  0x23   :  { %721 = dma.done.wait [#allocation3], 512  }
  0x24   :  { %722 = vsyncadd [#allocation3], 4294966784 }
  0x25   :  { %723 = dma.done.wait [#allocation6], 4096  }
  0x26   :  { %724 = vsyncadd [#allocation6], 4294963200  ;;  %v734_v0 = vmov 0   ;;  %v593_v1 = vld [vmem:[#allocation5 + $0x74] ss:$8 sps:$4 sm:$0xff]   ;;  %v621_v16 = vld [vmem:[#allocation7 + $0x68] sm:$0xff]   ;;  %v93_v39 = vlaneseq }
  0x27   :  { %215 = vmatprep.mubr.bf16.mxu0 %v734_v0  ;;  %v595_v2 = vld [vmem:[#allocation5 + $0x70] ss:$8 sps:$4 sm:$0xff]   ;;  %183 = vmatprep.subr.bf16.mxu0 %v593_v1  ;;  %v596_v3 = vld [vmem:[#allocation5 + $0x64] ss:$8 sps:$4 sm:$0xff]   ;;  %v598_v4 = vld [vmem:[#allocation5 + $0x60] ss:$8 sps:$4 sm:$0xff]  }
  0x28   :  { %184 = vmatpush1.bf16.msra.mxu0 %v595_v2  ;;  %v599_v5 = vld [vmem:[#allocation5 + $0x54] ss:$8 sps:$4 sm:$0xff]   ;;  %v601_v6 = vld [vmem:[#allocation5 + $0x50] ss:$8 sps:$4 sm:$0xff]   ;;  %v602_v7 = vld [vmem:[#allocation5 + $0x44] ss:$8 sps:$4 sm:$0xff]  }
  0x29   :  { %185 = vmatprep.subr.bf16.mxu0 %v596_v3  ;;  %v604_v8 = vld [vmem:[#allocation5 + $0x40] ss:$8 sps:$4 sm:$0xff]   ;;  %v605_v9 = vld [vmem:[#allocation5 + $0x34] ss:$8 sps:$4 sm:$0xff]   ;;  %v607_v11 = vld [vmem:[#allocation5 + $0x30] ss:$8 sps:$4 sm:$0xff]  }
  0x2a   :  { %v617_v10 = vld [vmem:[#allocation7 + $0x78] sm:$0xff]   ;;  %v608_v13 = vld [vmem:[#allocation5 + $0x24] ss:$8 sps:$4 sm:$0xff]   ;;  %v619_v14 = vld [vmem:[#allocation7 + $0x70] sm:$0xff]   ;;  %v94_v40 = vshrl.u32 %v93_v39, 7 }
  0x2b   :  { %v618_v12 = vld [vmem:[#allocation7 + $0x38] sm:$0xff]   ;;  %556 = vmatprep.subr.bf16.mxu1 %v617_v10  ;;  %v620_v15 = vld [vmem:[#allocation7 + $0x30] sm:$0xff]   ;;  %v610_v17 = vld [vmem:[#allocation5 + $0x20] ss:$8 sps:$4 sm:$0xff]  }
  0x2c   :  { %186 = vmatpush1.bf16.msra.mxu0 %v598_v4  ;;  %557 = vmatpush3.bf16.msra.mxu1 %v618_v12  ;;  %v611_v18 = vld [vmem:[#allocation5 + $0x14] ss:$8 sps:$4 sm:$0xff]   ;;  %v622_v19 = vld [vmem:[#allocation7 + $0x28] sm:$0xff]   ;;  %v623_v20 = vld [vmem:[#allocation7 + $0x60] sm:$0xff]   ;;  %v99_v41 = vsub.s32 1, %v94_v40  ;;  %v95_v42 = vsub.s32 0, %v94_v40 }
  0x2d   :  { %187 = vmatprep.subr.bf16.mxu0 %v599_v5  ;;  %558 = vmatprep.subr.bf16.mxu1 %v619_v14  ;;  %v613_v21 = vld [vmem:[#allocation5 + $0x10] ss:$8 sps:$4 sm:$0xff]   ;;  %v624_v22 = vld [vmem:[#allocation7 + $0x20] sm:$0xff]   ;;  %v793_v27 = vld [vmem:[#allocation2 + $0x8] sm:$0xff] }
  0x2e   :  { %v614_v23 = vld [vmem:[#allocation5 + $0x4] ss:$8 sps:$4 sm:$0xff]   ;;  %v625_v24 = vld [vmem:[#allocation7 + $0x58] sm:$0xff]   ;;  %v616_v25 = vld [vmem:[#allocation5] ss:$8 sps:$4 sm:$0xff]  }
  0x2f   :  { %v791_v26 = vld [vmem:[#allocation2] sm:$0xff]  ;;  %v626_v28 = vld [vmem:[#allocation7 + $0x18] sm:$0xff]   ;;  %v797_v30 = vld [vmem:[#allocation2 + $0x10] sm:$0xff] }
  0x30   :  { %188 = vmatpush1.bf16.msra.mxu0 %v601_v6  ;;  %559 = vmatpush3.bf16.msra.mxu1 %v620_v15  ;;  %v73_v29 = vpack.c.bf16 %v793_v27, %v791_v26  ;;  %v799_v31 = vld [vmem:[#allocation2 + $0x18] sm:$0xff]  ;;  %v627_v33 = vld [vmem:[#allocation7 + $0x50] sm:$0xff]   ;;  %v629_v35 = vld [vmem:[#allocation7 + $0x48] sm:$0xff]  }
  0x31   :  { %189 = vmatprep.subr.bf16.mxu0 %v602_v7  ;;  %560 = vmatprep.subr.bf16.mxu1 %v621_v16  ;;  %v74_v32 = vpack.c.bf16 %v799_v31, %v797_v30  ;;  %v628_v34 = vld [vmem:[#allocation7 + $0x10] sm:$0xff]   ;;  %v630_v36 = vld [vmem:[#allocation7 + $0x8] sm:$0xff]   ;;  %v631_v37 = vld [vmem:[#allocation7 + $0x40] sm:$0xff]  }
  0x32   :  { %v632_v38 = vld [vmem:[#allocation7] sm:$0xff]  }
  0x33   :  { %v91_v44 = vld [vmem:[%s827_s2] sm:$0x3] }
  0x34   :  { %190 = vmatpush1.bf16.msra.mxu0 %v604_v8  ;;  %561 = vmatpush3.bf16.msra.mxu1 %v622_v19  ;;  %v100_v46 = vrot.slane %v91_v44, %v99_v41  ;;  %v96_v47 = vrot.slane %v91_v44, %v95_v42  ;;  %v537_v3 = vld [vmem:[%s829_s4] ss:$0 sm:$0xff] }
  0x35   :  { %191 = vmatprep.subr.bf16.mxu0 %v605_v9  ;;  %562 = vmatprep.subr.bf16.mxu1 %v623_v20 }
  0x38   :  { %192 = vmatpush1.bf16.msra.mxu0 %v607_v11  ;;  %563 = vmatpush3.bf16.msra.mxu1 %v624_v22 }
  0x39   :  { %193 = vmatprep.subr.bf16.mxu0 %v608_v13  ;;  %564 = vmatprep.subr.bf16.mxu1 %v625_v24 }
  0x3c   :  { %194 = vmatpush1.bf16.msra.mxu0 %v610_v17  ;;  %565 = vmatpush3.bf16.msra.mxu1 %v626_v28 }
  0x3d   :  { %195 = vmatprep.subr.bf16.mxu0 %v611_v18  ;;  %566 = vmatprep.subr.bf16.mxu1 %v627_v33 }
  0x40   :  { %196 = vmatpush1.bf16.msra.mxu0 %v613_v21  ;;  %567 = vmatpush3.bf16.msra.mxu1 %v628_v34 }
  0x41   :  { %197 = vmatprep.subr.bf16.mxu0 %v614_v23  ;;  %568 = vmatprep.subr.bf16.mxu1 %v629_v35 }
  0x44   :  { %198 = vmatpush1.bf16.msra.mxu0 %v616_v25  ;;  %569 = vmatpush3.bf16.msra.mxu1 %v630_v36 }
  0x45   :  { %570 = vmatprep.subr.bf16.mxu1 %v631_v37 }
  0x47   :  { %216 = vmatmul.mubr.bf16.vlgmr.msra.gmra.mxu0 %v73_v29 }
  0x48   :  { %225 = vmatprep.mubr.bf16.mxu0 %v734_v0  ;;  %571 = vmatpush3.bf16.msra.mxu1 %v632_v38 }
  0x4f   :  { %226 = vmatmul.mubr.bf16.gmra.mxu0 %v74_v32 }
 0x107   :  { %v217_v43 = vpop.f32.mrf.mxu0 }
 0x108   :  { %v218_v53 = vadd.f32 %v217_v43, %v96_v47 }
 0x109   :  { %v219_v45 = vpop.f32.mrf.mxu0 }
 0x10a   :  { %v220_v51 = vadd.f32 %v219_v45, %v100_v46 }
 0x10b   :  { %v221_v48 = vpop.f32.mrf.mxu0 }
 0x10c   :  { %v222_v49 = vadd.f32 %v221_v48, %v96_v47 }
 0x10d   :  { %v223_v50 = vpop.f32.mrf.mxu0 }
 0x10e   :  { %v224_v52 = vadd.f32 %v223_v50, %v100_v46  ;;  %v236_v56 = vpack.c.bf16 %v222_v49, %v218_v53 }
 0x10f   :  { %v227_v54 = vpop.f32.mrf.mxu0 }
 0x110   :  { %v237_v55 = vpack.c.bf16 %v224_v52, %v220_v51  ;;  %v228_v63 = vadd.f32 %v227_v54, %v96_v47 }
 0x111   :  { %v229_v57 = vpop.f32.mrf.mxu0 }
 0x112   :  { %407 = vmatprep.mubr.bf16.mxu1 %v237_v55  ;;  %v230_v61 = vadd.f32 %v229_v57, %v100_v46 }
 0x113   :  { %v231_v58 = vpop.f32.mrf.mxu0  ;;  %408 = vmatmul.mubr.bf16.vlgmr.msra.gmra.mxu1 %v236_v56  ;;  %v554_v56 = vld [vmem:[%s830_s5] ss:$0 sm:$0xff]  ;;  %s735_s5 = smov [#allocation8]  }
 0x114   :  { %v232_v59 = vadd.f32 %v231_v58, %v96_v47  ;;  %v555_v58 = vld [vmem:[%s831_s6] ss:$0 sm:$0xff]  ;;  %s508_s23 = sshll.u32 %s735_s5, 4  ;;  %s509_s23 = int_to_ptr.vmem [resolvable:$true] %s508_s23 }
 0x115   :  { %v233_v60 = vpop.f32.mrf.mxu0  ;;  %s701_s6 = scalar_lea.vmem %s509_s23, 512  ;;  %p706_p2 = scmp.lt.s32.totalorder %s509_s23, %s509_s23 }
 0x116   :  { %v234_v62 = vadd.f32 %v233_v60, %v100_v46  ;;  %v238_v1 = vpack.c.bf16 %v232_v59, %v228_v63  ;;  %p702_p1 = scmp.ne.s32.totalorder %s509_s23, %s701_s6  ;;  %p707_p3 = scmp.lt.s32.totalorder %s701_s6, %s701_s6 }
 0x118   :  { %v239_v0 = vpack.c.bf16 %v234_v62, %v230_v61  ;;  %p708_p4 = por %p707_p3, %p706_p2 }
 0x11a   :  { %415 = vmatprep.mubr.bf16.mxu1 %v239_v0  ;;  %p709_p5 = pnand %p708_p4, %p702_p1 }
 0x11b   :  { %416 = vmatmul.mubr.bf16.gmra.mxu1 %v238_v1 }
 0x1d3   :  { %v572_v2 = vpop.f32.mrf.mxu1 }
 0x1d5   :  { %v573_v4 = vpop.f32.mrf.mxu1 }
 0x1d6   :  { %v574_v5 = vadd.f32 %v573_v4, %v572_v2 }
 0x1d7   :  { %v575_v6 = vpop.f32.mrf.mxu1 }
 0x1d8   :  { %v410_v7 = vadd.f32 %v574_v5, %v537_v3 }
 0x1d9   :  { %v576_v8 = vpop.f32.mrf.mxu1 }
 0x1da   :  { %v424_v9 = vmax.f32 %v410_v7, 0.0  ;;  %v577_v10 = vadd.f32 %v576_v8, %v575_v6 }
 0x1db   :  { %v578_v11 = vpop.f32.mrf.mxu1 }
 0x1dc   :  { %v413_v12 = vadd.f32 %v577_v10, %v537_v3  ;;  %v428_v13 = vadd.f32 %v424_v9, %v791_v26 }
 0x1dd   :  { %v579_v14 = vpop.f32.mrf.mxu1 }
 0x1de   :  { %v425_v15 = vmax.f32 %v413_v12, 0.0  ;;  %v580_v16 = vadd.f32 %v579_v14, %v578_v11  ;;  %432 = vadd.xlane.f32.xlu0 %v428_v13 }
 0x1df   :  { %v581_v17 = vpop.f32.mrf.mxu1 }
 0x1e0   :  { %v418_v18 = vadd.f32 %v580_v16, %v537_v3  ;;  %v429_v19 = vadd.f32 %v425_v15, %v793_v27 }
 0x1e1   :  { %v582_v20 = vpop.f32.mrf.mxu1 }
 0x1e2   :  { %v426_v21 = vmax.f32 %v418_v18, 0.0  ;;  %v583_v22 = vadd.f32 %v582_v20, %v581_v17  ;;  %434 = vadd.xlane.f32.xlu0 %v429_v19 }
 0x1e4   :  { %v421_v23 = vadd.f32 %v583_v22, %v537_v3  ;;  %v430_v24 = vadd.f32 %v426_v21, %v797_v30 }
 0x1e6   :  { %v427_v25 = vmax.f32 %v421_v23, 0.0  ;;  %436 = vadd.xlane.f32.xlu1 %v430_v24 }
 0x1e8   :  { %v431_v28 = vadd.f32 %v427_v25, %v799_v31 }
 0x1ea   :  { %438 = vadd.xlane.f32.xlu1 %v431_v28 }
 0x267   :  { %v433_v26 = vpop.xlane.xlu0 %432 }
 0x268   :  { %v441_v29 = vmul.f32 0.0078125, %v433_v26 }
 0x26a   :  { %v445_v32 = vsub.f32 %v428_v13, %v441_v29 }
 0x26b   :  { %v435_v33 = vpop.xlane.xlu0 %434 }
 0x26c   :  { %v442_v34 = vmul.f32 0.0078125, %v435_v33  ;;  %v449_v35 = vmul.f32 %v445_v32, %v445_v32 }
 0x26e   :  { %v446_v36 = vsub.f32 %v429_v19, %v442_v34  ;;  %453 = vadd.xlane.f32.xlu0 %v449_v35 }
 0x26f   :  { %v437_v27 = vpop.xlane.xlu1 %436 }
 0x270   :  { %v443_v37 = vmul.f32 0.0078125, %v437_v27  ;;  %v450_v38 = vmul.f32 %v446_v36, %v446_v36 }
 0x272   :  { %v447_v39 = vsub.f32 %v430_v24, %v443_v37  ;;  %455 = vadd.xlane.f32.xlu1 %v450_v38 }
 0x273   :  { %v439_v40 = vpop.xlane.xlu1 %438 }
 0x274   :  { %v444_v30 = vmul.f32 0.0078125, %v439_v40  ;;  %v451_v41 = vmul.f32 %v447_v39, %v447_v39 }
 0x276   :  { %v448_v42 = vsub.f32 %v431_v28, %v444_v30  ;;  %457 = vadd.xlane.f32.xlu0 %v451_v41 }
 0x278   :  { %v452_v31 = vmul.f32 %v448_v42, %v448_v42 }
 0x27a   :  { %459 = vadd.xlane.f32.xlu1 %v452_v31 }
 0x2f7   :  { %v454_v43 = vpop.xlane.xlu0 %453 }
 0x2f8   :  { %v461_v44 = vmul.f32 0.0078125, %v454_v43 }
 0x2fa   :  { %v465_v45 = vadd.f32 1e-05, %v461_v44 }
 0x2fb   :  { %v456_v46 = vpop.xlane.xlu1 %455 }
 0x2fc   :  { %633 = vrsqrt.f32 %v465_v45  ;;  %v462_v47 = vmul.f32 0.0078125, %v456_v46 }
 0x2fe   :  { %v466_v48 = vadd.f32 1e-05, %v462_v47 }
 0x2ff   :  { %v458_v49 = vpop.xlane.xlu0 %457 }
 0x300   :  { %635 = vrsqrt.f32 %v466_v48  ;;  %v463_v50 = vmul.f32 0.0078125, %v458_v49 }
 0x302   :  { %v467_v51 = vadd.f32 1e-05, %v463_v50 }
 0x303   :  { %v460_v52 = vpop.xlane.xlu1 %459 }
 0x304   :  { %637 = vrsqrt.f32 %v467_v51  ;;  %v464_v53 = vmul.f32 0.0078125, %v460_v52 }
 0x306   :  { %v468_v54 = vadd.f32 1e-05, %v464_v53 }
 0x308   :  { %639 = vrsqrt.f32 %v468_v54 }
 0x309   :  { %v634_v55 = vpop.eup %633 }
 0x30a   :  { %v473_v57 = vmul.f32 %v634_v55, %v445_v32 }
 0x30c   :  { %v484_v59 = vmul.f32 %v554_v56, %v473_v57 }
 0x30d   :  { %v636_v60 = vpop.eup %635 }
 0x30e   :  { %v474_v61 = vmul.f32 %v636_v60, %v446_v36  ;;  %v495_v62 = vadd.f32 %v555_v58, %v484_v59 }
 0x310   :  { %v485_v63 = vmul.f32 %v554_v56, %v474_v61  ;;  %499 = vst [vmem:[#allocation8] sm:$0xff] %v495_v62 }
 0x311   :  { %v638_v0 = vpop.eup %637 }
 0x312   :  { %v475_v1 = vmul.f32 %v638_v0, %v447_v39  ;;  %v496_v2 = vadd.f32 %v555_v58, %v485_v63 }
 0x314   :  { %v486_v3 = vmul.f32 %v554_v56, %v475_v1  ;;  %500 = vst [vmem:[#allocation8 + $0x8] sm:$0xff] %v496_v2 }
 0x315   :  { %v640_v4 = vpop.eup %639 }
 0x316   :  { %v476_v5 = vmul.f32 %v640_v4, %v448_v42  ;;  %v497_v6 = vadd.f32 %v555_v58, %v486_v3 }
 0x318   :  { %v487_v7 = vmul.f32 %v554_v56, %v476_v5  ;;  %501 = vst [vmem:[#allocation8 + $0x10] sm:$0xff] %v497_v6 }
 0x31a   :  { %v498_v8 = vadd.f32 %v555_v58, %v487_v7 }
 0x31c   :  { %502 = vst [vmem:[#allocation8 + $0x18] sm:$0xff] %v498_v8 }
 0x31d   :  { %712 = shalt.err (!%p709_p5)
}
 0x31e   :  { %514 = dma.vmem_to_hbm [thread:$0]  %s509_s23, 512, %s832_s7, [#allocation4], %s729_s29, %s729_s29, %s730_s30  }
 0x31f   :  { %725 = dma.done.wait [#allocation4], 512  }
 0x320   :  { %726 = vsyncadd [#allocation4], 4294966784 }
 0x321   :  { %518 = vsyncpa [#allocation3], 1 }
 0x322   :  { %519 = vsyncpa [#allocation6], 1 }
 0x323   :  { %520 = vsyncpa [#allocation4], 1 }

// kernel: tpu_custom_call.1
= control target key start
LH: loop header
LB: loop body
LE: loop exit
PB: predicated region body
PF: predicated region fallthrough
CT: control target
= control target key end

     0   :  { %12 = vsyncpa [#allocation3], 0  ;;  %s825_s0 = inlined_call_operand.hbm [shape: f32[32,128], index: 0, kind: input, shape index: {}]   ;;  %s826_s1 = inlined_call_operand.hbm [shape: bf16[128,256], index: 1, kind: input, shape index: {}]   ;;  %s827_s2 = inlined_call_operand.vmem [shape: f32[1,256], index: 2, kind: input, shape index: {}]   ;;  %s828_s3 = inlined_call_operand.hbm [shape: bf16[256,128], index: 3, kind: input, shape index: {}]   ;;  %s829_s4 = inlined_call_operand.vmem [shape: f32[1,128], index: 4, kind: input, shape index: {}]   ;;  %s830_s5 = inlined_call_operand.vmem [shape: f32[1,128], index: 5, kind: input, shape index: {}]   ;;  %s831_s6 = inlined_call_operand.vmem [shape: f32[1,128], index: 6, kind: input, shape index: {}]   ;;  %s832_s7 = inlined_call_operand.hbm [shape: f32[32,128], index: 7, kind: output, shape index: {}]  }
   0x1   :  { %13 = vsyncpa [#allocation6], 0 }
   0x2   :  { %14 = vsyncpa [#allocation4], 0  ;;  %s727_s24 = smov [#allocation5]   ;;  %s728_s26 = smov [#allocation2]  }
   0x3   :  { %s32_s25 = sshll.u32 %s727_s24, 4  ;;  %s20_s27 = sshll.u32 %s728_s26, 4  ;;  %s33_s25 = int_to_ptr.vmem [resolvable:$true] %s32_s25  ;;  %s21_s27 = int_to_ptr.vmem [resolvable:$true] %s20_s27 }
   0x4   :  { %s649_s28 = scalar_lea.vmem %s33_s25, 2048  ;;  %p654_p1 = scmp.lt.s32.totalorder %s33_s25, %s33_s25 }
   0x5   :  { %p650_p0 = scmp.ne.s32.totalorder %s33_s25, %s649_s28  ;;  %p655_p2 = scmp.lt.s32.totalorder %s649_s28, %s649_s28 }
   0x7   :  { %p656_p3 = por %p655_p2, %p654_p1 }
   0x9   :  { %p657_p4 = pnand %p656_p3, %p650_p0 }
   0xb   :  { %660 = shalt.err (!%p657_p4)
}
   0xc   :  { %s729_s29 = smov 128   ;;  %s730_s30 = smov 8  }
   0xd   :  { %38 = dma.hbm_to_vmem [thread:$0]  %s826_s1, 2048, %s33_s25, [#allocation6], %s729_s29, %s729_s29, %s730_s30  }
   0xe   :  { %s669_s10 = scalar_lea.vmem %s21_s27, 512  ;;  %p674_p6 = scmp.lt.s32.totalorder %s21_s27, %s21_s27 }
   0xf   :  { %p670_p5 = scmp.ne.s32.totalorder %s21_s27, %s669_s10  ;;  %p675_p7 = scmp.lt.s32.totalorder %s669_s10, %s669_s10 }
  0x11   :  { %p676_p8 = por %p675_p7, %p674_p6 }
  0x13   :  { %p677_p9 = pnand %p676_p8, %p670_p5 }
  0x15   :  { %680 = shalt.err (!%p677_p9)
}
  0x16   :  { %26 = dma.hbm_to_vmem [thread:$0]  %s825_s0, 512, %s21_s27, [#allocation3], %s729_s29, %s729_s29, %s730_s30  }
  0x17   :  { %s731_s13 = smov [#allocation7]  }
  0x18   :  { %s46_s14 = sshll.u32 %s731_s13, 4  ;;  %s47_s14 = int_to_ptr.vmem [resolvable:$true] %s46_s14 }
  0x19   :  { %s689_s15 = scalar_lea.vmem %s47_s14, 2048  ;;  %p694_p11 = scmp.lt.s32.totalorder %s47_s14, %s47_s14 }
  0x1a   :  { %p690_p10 = scmp.ne.s32.totalorder %s47_s14, %s689_s15  ;;  %p695_p12 = scmp.lt.s32.totalorder %s689_s15, %s689_s15 }
  0x1c   :  { %p696_p13 = por %p695_p12, %p694_p11 }
  0x1e   :  { %p697_p0 = pnand %p696_p13, %p690_p10 }
  0x20   :  { %700 = shalt.err (!%p697_p0)
}
  0x21   :  { %s732_s1 = smov 64   ;;  %s733_s16 = smov 4  }
  0x22   :  { %52 = dma.hbm_to_vmem [thread:$0]  %s828_s3, 2048, %s47_s14, [#allocation6], %s732_s1, %s732_s1, %s733_s16  }
  0x23   :  { %721 = dma.done.wait [#allocation3], 512  }
  0x24   :  { %722 = vsyncadd [#allocation3], 4294966784 }
  0x25   :  { %723 = dma.done.wait [#allocation6], 4096  }
  0x26   :  { %724 = vsyncadd [#allocation6], 4294963200  ;;  %v734_v0 = vmov 0   ;;  %v593_v1 = vld [vmem:[#allocation5 + $0x74] ss:$8 sps:$4 sm:$0xff]   ;;  %v621_v16 = vld [vmem:[#allocation7 + $0x68] sm:$0xff]   ;;  %v93_v39 = vlaneseq }
  0x27   :  { %215 = vmatprep.mubr.bf16.mxu0 %v734_v0  ;;  %v595_v2 = vld [vmem:[#allocation5 + $0x70] ss:$8 sps:$4 sm:$0xff]   ;;  %183 = vmatprep.subr.bf16.mxu0 %v593_v1  ;;  %v596_v3 = vld [vmem:[#allocation5 + $0x64] ss:$8 sps:$4 sm:$0xff]   ;;  %v598_v4 = vld [vmem:[#allocation5 + $0x60] ss:$8 sps:$4 sm:$0xff]  }
  0x28   :  { %184 = vmatpush1.bf16.msra.mxu0 %v595_v2  ;;  %v599_v5 = vld [vmem:[#allocation5 + $0x54] ss:$8 sps:$4 sm:$0xff]   ;;  %v601_v6 = vld [vmem:[#allocation5 + $0x50] ss:$8 sps:$4 sm:$0xff]   ;;  %v602_v7 = vld [vmem:[#allocation5 + $0x44] ss:$8 sps:$4 sm:$0xff]  }
  0x29   :  { %185 = vmatprep.subr.bf16.mxu0 %v596_v3  ;;  %v604_v8 = vld [vmem:[#allocation5 + $0x40] ss:$8 sps:$4 sm:$0xff]   ;;  %v605_v9 = vld [vmem:[#allocation5 + $0x34] ss:$8 sps:$4 sm:$0xff]   ;;  %v607_v11 = vld [vmem:[#allocation5 + $0x30] ss:$8 sps:$4 sm:$0xff]  }
  0x2a   :  { %v617_v10 = vld [vmem:[#allocation7 + $0x78] sm:$0xff]   ;;  %v608_v13 = vld [vmem:[#allocation5 + $0x24] ss:$8 sps:$4 sm:$0xff]   ;;  %v619_v14 = vld [vmem:[#allocation7 + $0x70] sm:$0xff]   ;;  %v94_v40 = vshrl.u32 %v93_v39, 7 }
  0x2b   :  { %v618_v12 = vld [vmem:[#allocation7 + $0x38] sm:$0xff]   ;;  %556 = vmatprep.subr.bf16.mxu1 %v617_v10  ;;  %v620_v15 = vld [vmem:[#allocation7 + $0x30] sm:$0xff]   ;;  %v610_v17 = vld [vmem:[#allocation5 + $0x20] ss:$8 sps:$4 sm:$0xff]  }
  0x2c   :  { %186 = vmatpush1.bf16.msra.mxu0 %v598_v4  ;;  %557 = vmatpush3.bf16.msra.mxu1 %v618_v12  ;;  %v611_v18 = vld [vmem:[#allocation5 + $0x14] ss:$8 sps:$4 sm:$0xff]   ;;  %v622_v19 = vld [vmem:[#allocation7 + $0x28] sm:$0xff]   ;;  %v623_v20 = vld [vmem:[#allocation7 + $0x60] sm:$0xff]   ;;  %v99_v41 = vsub.s32 1, %v94_v40  ;;  %v95_v42 = vsub.s32 0, %v94_v40 }
  0x2d   :  { %187 = vmatprep.subr.bf16.mxu0 %v599_v5  ;;  %558 = vmatprep.subr.bf16.mxu1 %v619_v14  ;;  %v613_v21 = vld [vmem:[#allocation5 + $0x10] ss:$8 sps:$4 sm:$0xff]   ;;  %v624_v22 = vld [vmem:[#allocation7 + $0x20] sm:$0xff]   ;;  %v793_v27 = vld [vmem:[#allocation2 + $0x8] sm:$0xff] }
  0x2e   :  { %v614_v23 = vld [vmem:[#allocation5 + $0x4] ss:$8 sps:$4 sm:$0xff]   ;;  %v625_v24 = vld [vmem:[#allocation7 + $0x58] sm:$0xff]   ;;  %v616_v25 = vld [vmem:[#allocation5] ss:$8 sps:$4 sm:$0xff]  }
  0x2f   :  { %v791_v26 = vld [vmem:[#allocation2] sm:$0xff]  ;;  %v626_v28 = vld [vmem:[#allocation7 + $0x18] sm:$0xff]   ;;  %v797_v30 = vld [vmem:[#allocation2 + $0x10] sm:$0xff] }
  0x30   :  { %188 = vmatpush1.bf16.msra.mxu0 %v601_v6  ;;  %559 = vmatpush3.bf16.msra.mxu1 %v620_v15  ;;  %v73_v29 = vpack.c.bf16 %v793_v27, %v791_v26  ;;  %v799_v31 = vld [vmem:[#allocation2 + $0x18] sm:$0xff]  ;;  %v627_v33 = vld [vmem:[#allocation7 + $0x50] sm:$0xff]   ;;  %v629_v35 = vld [vmem:[#allocation7 + $0x48] sm:$0xff]  }
  0x31   :  { %189 = vmatprep.subr.bf16.mxu0 %v602_v7  ;;  %560 = vmatprep.subr.bf16.mxu1 %v621_v16  ;;  %v74_v32 = vpack.c.bf16 %v799_v31, %v797_v30  ;;  %v628_v34 = vld [vmem:[#allocation7 + $0x10] sm:$0xff]   ;;  %v630_v36 = vld [vmem:[#allocation7 + $0x8] sm:$0xff]   ;;  %v631_v37 = vld [vmem:[#allocation7 + $0x40] sm:$0xff]  }
  0x32   :  { %v632_v38 = vld [vmem:[#allocation7] sm:$0xff]  }
  0x33   :  { %v91_v44 = vld [vmem:[%s827_s2] sm:$0x3] }
  0x34   :  { %190 = vmatpush1.bf16.msra.mxu0 %v604_v8  ;;  %561 = vmatpush3.bf16.msra.mxu1 %v622_v19  ;;  %v100_v46 = vrot.slane %v91_v44, %v99_v41  ;;  %v96_v47 = vrot.slane %v91_v44, %v95_v42  ;;  %v537_v3 = vld [vmem:[%s829_s4] ss:$0 sm:$0xff] }
  0x35   :  { %191 = vmatprep.subr.bf16.mxu0 %v605_v9  ;;  %562 = vmatprep.subr.bf16.mxu1 %v623_v20 }
  0x38   :  { %192 = vmatpush1.bf16.msra.mxu0 %v607_v11  ;;  %563 = vmatpush3.bf16.msra.mxu1 %v624_v22 }
  0x39   :  { %193 = vmatprep.subr.bf16.mxu0 %v608_v13  ;;  %564 = vmatprep.subr.bf16.mxu1 %v625_v24 }
  0x3c   :  { %194 = vmatpush1.bf16.msra.mxu0 %v610_v17  ;;  %565 = vmatpush3.bf16.msra.mxu1 %v626_v28 }
  0x3d   :  { %195 = vmatprep.subr.bf16.mxu0 %v611_v18  ;;  %566 = vmatprep.subr.bf16.mxu1 %v627_v33 }
  0x40   :  { %196 = vmatpush1.bf16.msra.mxu0 %v613_v21  ;;  %567 = vmatpush3.bf16.msra.mxu1 %v628_v34 }
  0x41   :  { %197 = vmatprep.subr.bf16.mxu0 %v614_v23  ;;  %568 = vmatprep.subr.bf16.mxu1 %v629_v35 }
  0x44   :  { %198 = vmatpush1.bf16.msra.mxu0 %v616_v25  ;;  %569 = vmatpush3.bf16.msra.mxu1 %v630_v36 }
  0x45   :  { %570 = vmatprep.subr.bf16.mxu1 %v631_v37 }
  0x47   :  { %216 = vmatmul.mubr.bf16.vlgmr.msra.gmra.mxu0 %v73_v29 }
  0x48   :  { %225 = vmatprep.mubr.bf16.mxu0 %v734_v0  ;;  %571 = vmatpush3.bf16.msra.mxu1 %v632_v38 }
  0x4f   :  { %226 = vmatmul.mubr.bf16.gmra.mxu0 %v74_v32 }
 0x107   :  { %v217_v43 = vpop.f32.mrf.mxu0 }
 0x108   :  { %v218_v53 = vadd.f32 %v217_v43, %v96_v47 }
 0x109   :  { %v219_v45 = vpop.f32.mrf.mxu0 }
 0x10a   :  { %v220_v51 = vadd.f32 %v219_v45, %v100_v46 }
 0x10b   :  { %v221_v48 = vpop.f32.mrf.mxu0 }
 0x10c   :  { %v222_v49 = vadd.f32 %v221_v48, %v96_v47 }
 0x10d   :  { %v223_v50 = vpop.f32.mrf.mxu0 }
 0x10e   :  { %v224_v52 = vadd.f32 %v223_v50, %v100_v46  ;;  %v236_v56 = vpack.c.bf16 %v222_v49, %v218_v53 }
 0x10f   :  { %v227_v54 = vpop.f32.mrf.mxu0 }
 0x110   :  { %v237_v55 = vpack.c.bf16 %v224_v52, %v220_v51  ;;  %v228_v63 = vadd.f32 %v227_v54, %v96_v47 }
 0x111   :  { %v229_v57 = vpop.f32.mrf.mxu0 }
 0x112   :  { %407 = vmatprep.mubr.bf16.mxu1 %v237_v55  ;;  %v230_v61 = vadd.f32 %v229_v57, %v100_v46 }
 0x113   :  { %v231_v58 = vpop.f32.mrf.mxu0  ;;  %408 = vmatmul.mubr.bf16.vlgmr.msra.gmra.mxu1 %v236_v56  ;;  %v554_v56 = vld [vmem:[%s830_s5] ss:$0 sm:$0xff]  ;;  %s735_s5 = smov [#allocation8]  }
 0x114   :  { %v232_v59 = vadd.f32 %v231_v58, %v96_v47  ;;  %v555_v58 = vld [vmem:[%s831_s6] ss:$0 sm:$0xff]  ;;  %s508_s23 = sshll.u32 %s735_s5, 4  ;;  %s509_s23 = int_to_ptr.vmem [resolvable:$true] %s508_s23 }
 0x115   :  { %v233_v60 = vpop.f32.mrf.mxu0  ;;  %s701_s6 = scalar_lea.vmem %s509_s23, 512  ;;  %p706_p2 = scmp.lt.s32.totalorder %s509_s23, %s509_s23 }
 0x116   :  { %v234_v62 = vadd.f32 %v233_v60, %v100_v46  ;;  %v238_v1 = vpack.c.bf16 %v232_v59, %v228_v63  ;;  %p702_p1 = scmp.ne.s32.totalorder %s509_s23, %s701_s6  ;;  %p707_p3 = scmp.lt.s32.totalorder %s701_s6, %s701_s6 }
 0x118   :  { %v239_v0 = vpack.c.bf16 %v234_v62, %v230_v61  ;;  %p708_p4 = por %p707_p3, %p706_p2 }
 0x11a   :  { %415 = vmatprep.mubr.bf16.mxu1 %v239_v0  ;;  %p709_p5 = pnand %p708_p4, %p702_p1 }
 0x11b   :  { %416 = vmatmul.mubr.bf16.gmra.mxu1 %v238_v1 }
 0x1d3   :  { %v572_v2 = vpop.f32.mrf.mxu1 }
 0x1d5   :  { %v573_v4 = vpop.f32.mrf.mxu1 }
 0x1d6   :  { %v574_v5 = vadd.f32 %v573_v4, %v572_v2 }
 0x1d7   :  { %v575_v6 = vpop.f32.mrf.mxu1 }
 0x1d8   :  { %v410_v7 = vadd.f32 %v574_v5, %v537_v3 }
 0x1d9   :  { %v576_v8 = vpop.f32.mrf.mxu1 }
 0x1da   :  { %v424_v9 = vmax.f32 %v410_v7, 0.0  ;;  %v577_v10 = vadd.f32 %v576_v8, %v575_v6 }
 0x1db   :  { %v578_v11 = vpop.f32.mrf.mxu1 }
 0x1dc   :  { %v413_v12 = vadd.f32 %v577_v10, %v537_v3  ;;  %v428_v13 = vadd.f32 %v424_v9, %v791_v26 }
 0x1dd   :  { %v579_v14 = vpop.f32.mrf.mxu1 }
 0x1de   :  { %v425_v15 = vmax.f32 %v413_v12, 0.0  ;;  %v580_v16 = vadd.f32 %v579_v14, %v578_v11  ;;  %432 = vadd.xlane.f32.xlu0 %v428_v13 }
 0x1df   :  { %v581_v17 = vpop.f32.mrf.mxu1 }
 0x1e0   :  { %v418_v18 = vadd.f32 %v580_v16, %v537_v3  ;;  %v429_v19 = vadd.f32 %v425_v15, %v793_v27 }
 0x1e1   :  { %v582_v20 = vpop.f32.mrf.mxu1 }
 0x1e2   :  { %v426_v21 = vmax.f32 %v418_v18, 0.0  ;;  %v583_v22 = vadd.f32 %v582_v20, %v581_v17  ;;  %434 = vadd.xlane.f32.xlu0 %v429_v19 }
 0x1e4   :  { %v421_v23 = vadd.f32 %v583_v22, %v537_v3  ;;  %v430_v24 = vadd.f32 %v426_v21, %v797_v30 }
 0x1e6   :  { %v427_v25 = vmax.f32 %v421_v23, 0.0  ;;  %436 = vadd.xlane.f32.xlu1 %v430_v24 }
 0x1e8   :  { %v431_v28 = vadd.f32 %v427_v25, %v799_v31 }
 0x1ea   :  { %438 = vadd.xlane.f32.xlu1 %v431_v28 }
 0x267   :  { %v433_v26 = vpop.xlane.xlu0 %432 }
 0x268   :  { %v441_v29 = vmul.f32 0.0078125, %v433_v26 }
 0x26a   :  { %v445_v32 = vsub.f32 %v428_v13, %v441_v29 }
 0x26b   :  { %v435_v33 = vpop.xlane.xlu0 %434 }
 0x26c   :  { %v442_v34 = vmul.f32 0.0078125, %v435_v33  ;;  %v449_v35 = vmul.f32 %v445_v32, %v445_v32 }
 0x26e   :  { %v446_v36 = vsub.f32 %v429_v19, %v442_v34  ;;  %453 = vadd.xlane.f32.xlu0 %v449_v35 }
 0x26f   :  { %v437_v27 = vpop.xlane.xlu1 %436 }
 0x270   :  { %v443_v37 = vmul.f32 0.0078125, %v437_v27  ;;  %v450_v38 = vmul.f32 %v446_v36, %v446_v36 }
 0x272   :  { %v447_v39 = vsub.f32 %v430_v24, %v443_v37  ;;  %455 = vadd.xlane.f32.xlu1 %v450_v38 }
 0x273   :  { %v439_v40 = vpop.xlane.xlu1 %438 }
 0x274   :  { %v444_v30 = vmul.f32 0.0078125, %v439_v40  ;;  %v451_v41 = vmul.f32 %v447_v39, %v447_v39 }
 0x276   :  { %v448_v42 = vsub.f32 %v431_v28, %v444_v30  ;;  %457 = vadd.xlane.f32.xlu0 %v451_v41 }
 0x278   :  { %v452_v31 = vmul.f32 %v448_v42, %v448_v42 }
 0x27a   :  { %459 = vadd.xlane.f32.xlu1 %v452_v31 }
 0x2f7   :  { %v454_v43 = vpop.xlane.xlu0 %453 }
 0x2f8   :  { %v461_v44 = vmul.f32 0.0078125, %v454_v43 }
 0x2fa   :  { %v465_v45 = vadd.f32 1e-05, %v461_v44 }
 0x2fb   :  { %v456_v46 = vpop.xlane.xlu1 %455 }
 0x2fc   :  { %633 = vrsqrt.f32 %v465_v45  ;;  %v462_v47 = vmul.f32 0.0078125, %v456_v46 }
 0x2fe   :  { %v466_v48 = vadd.f32 1e-05, %v462_v47 }
 0x2ff   :  { %v458_v49 = vpop.xlane.xlu0 %457 }
 0x300   :  { %635 = vrsqrt.f32 %v466_v48  ;;  %v463_v50 = vmul.f32 0.0078125, %v458_v49 }
 0x302   :  { %v467_v51 = vadd.f32 1e-05, %v463_v50 }
 0x303   :  { %v460_v52 = vpop.xlane.xlu1 %459 }
 0x304   :  { %637 = vrsqrt.f32 %v467_v51  ;;  %v464_v53 = vmul.f32 0.0078125, %v460_v52 }
 0x306   :  { %v468_v54 = vadd.f32 1e-05, %v464_v53 }
 0x308   :  { %639 = vrsqrt.f32 %v468_v54 }
 0x309   :  { %v634_v55 = vpop.eup %633 }
 0x30a   :  { %v473_v57 = vmul.f32 %v634_v55, %v445_v32 }
 0x30c   :  { %v484_v59 = vmul.f32 %v554_v56, %v473_v57 }
 0x30d   :  { %v636_v60 = vpop.eup %635 }
 0x30e   :  { %v474_v61 = vmul.f32 %v636_v60, %v446_v36  ;;  %v495_v62 = vadd.f32 %v555_v58, %v484_v59 }
 0x310   :  { %v485_v63 = vmul.f32 %v554_v56, %v474_v61  ;;  %499 = vst [vmem:[#allocation8] sm:$0xff] %v495_v62 }
 0x311   :  { %v638_v0 = vpop.eup %637 }
 0x312   :  { %v475_v1 = vmul.f32 %v638_v0, %v447_v39  ;;  %v496_v2 = vadd.f32 %v555_v58, %v485_v63 }
 0x314   :  { %v486_v3 = vmul.f32 %v554_v56, %v475_v1  ;;  %500 = vst [vmem:[#allocation8 + $0x8] sm:$0xff] %v496_v2 }
 0x315   :  { %v640_v4 = vpop.eup %639 }
 0x316   :  { %v476_v5 = vmul.f32 %v640_v4, %v448_v42  ;;  %v497_v6 = vadd.f32 %v555_v58, %v486_v3 }
 0x318   :  { %v487_v7 = vmul.f32 %v554_v56, %v476_v5  ;;  %501 = vst [vmem:[#allocation8 + $0x10] sm:$0xff] %v497_v6 }
 0x31a   :  { %v498_v8 = vadd.f32 %v555_v58, %v487_v7 }
 0x31c   :  { %502 = vst [vmem:[#allocation8 + $0x18] sm:$0xff] %v498_v8 }
 0x31d   :  { %712 = shalt.err (!%p709_p5)
}
 0x31e   :  { %514 = dma.vmem_to_hbm [thread:$0]  %s509_s23, 512, %s832_s7, [#allocation4], %s729_s29, %s729_s29, %s730_s30  }
 0x31f   :  { %725 = dma.done.wait [#allocation4], 512  }
 0x320   :  { %726 = vsyncadd [#allocation4], 4294966784 }
 0x321   :  { %518 = vsyncpa [#allocation3], 1 }
 0x322   :  { %519 = vsyncpa [#allocation6], 1 }
 0x323   :  { %520 = vsyncpa [#allocation4], 1 }

</bundles_post_ra>
